<compile_context>
chip_gen: v7x
topology: tpu7x:2x2x1
jax: 0.10.0
libtpu: 0.0.40
codegen_flags: <defaults>
</compile_context>

<pallas_src>
import functools

import jax
import jax.numpy as jnp
from jax.experimental import pallas as pl
from jax.experimental.pallas import tpu as pltpu


def _mlp_fused_kernel(*refs, n_layers: int):
    """Fused MLP forward on VMEM-resident tiles.

    refs = (x_ref, w1_ref, b1_ref, ..., wL_ref, bL_ref, o_ref).
    Hidden layers: h = relu(h @ W + b); final layer: no ReLU.
    All dots are bf16 x bf16 -> f32 accumulation (single MXU pass per layer);
    intermediate activations never leave registers/VMEM.
    """
    x_ref = refs[0]
    o_ref = refs[-1]
    h = x_ref[...].astype(jnp.bfloat16)  # free VPU cast; no-op if already bf16
    for i in range(n_layers):
        w_ref = refs[1 + 2 * i]  # (K, N) bf16
        b_ref = refs[2 + 2 * i]  # (1, N) f32
        acc = jnp.dot(h, w_ref[...], preferred_element_type=jnp.float32) + b_ref[...]
        if i < n_layers - 1:
            h = jnp.maximum(acc, 0.0).astype(jnp.bfloat16)  # re-narrow for next MXU pass
        else:
            h = acc
    o_ref[...] = h.astype(o_ref.dtype)


def prepare_params(params):
    """One-time param prep (call at init, NOT per forward):
      * weights -> bf16 (single-pass MXU, half the weight DMA bytes)
      * biases  -> (1, out) f32 rows (broadcast onto the f32 accumulator)
    No zero padding: true K/N shapes avoid wasted weight DMA / MXU passes, and
    sub-lane-width stores at these sizes are negligible."""
    prepped = []
    for w, b in params:
        prepped.append(
            (jnp.asarray(w, jnp.bfloat16), jnp.asarray(b, jnp.float32).reshape(1, -1))
        )
    return prepped


def mlp_forward_pallas(x, prepped_params, *, block_b=256):
    """Fused forward of TestModel.

    x:              (B, input_size) float32 (or bf16)
    prepped_params: output of prepare_params()
    Returns (B, output_size) float32.
    """
    n_layers = len(prepped_params)
    B, in_dim = x.shape
    out_dim = prepped_params[-1][0].shape[1]

    flat_inputs = [x]
    for w, b in prepped_params:
        flat_inputs.extend((w, b))

    # Advisory cost estimate: lets XLA treat this custom call as the tiny op it
    # is and overlap it with surrounding work.
    flops = 0
    for w, _ in prepped_params:
        flops += 2 * B * int(w.shape[0]) * int(w.shape[1]) + B * int(w.shape[1])
    bytes_accessed = sum(int(a.size) * a.dtype.itemsize for a in flat_inputs)
    bytes_accessed += B * out_dim * 4  # f32 output
    cost = pl.CostEstimate(flops=flops, transcendentals=0, bytes_accessed=bytes_accessed)

    kernel = functools.partial(_mlp_fused_kernel, n_layers=n_layers)
    out_shape = jax.ShapeDtypeStruct((B, out_dim), jnp.float32)

    # VMEM budget note: the all-weights-resident design must keep padded params
    # + activations well under the scoped-VMEM default (~32 MiB; hard cap
    # ~64 MiB on v7x, 128 MiB on v5e/v6e). Here it's a few tens of KB. For much
    # larger layers, switch to a grid over N (and K) with BlockSpec pipelining.
    if B > block_b and B % block_b == 0:
        # Large batch: tile rows so the grid shards across TensorCores (v7x)
        # and each matmul feeds >= block_b rows to the MXU.
        in_specs = [pl.BlockSpec((block_b, in_dim), lambda i: (i, 0))]
        for w, b in prepped_params:
            in_specs.append(pl.BlockSpec(w.shape, lambda i: (0, 0)))
            in_specs.append(pl.BlockSpec(b.shape, lambda i: (0, 0)))
        out_specs = pl.BlockSpec((block_b, out_dim), lambda i: (i, 0))
        return pl.pallas_call(
            kernel,
            out_shape=out_shape,
            grid=(B // block_b,),
            in_specs=in_specs,
            out_specs=out_specs,
            compiler_params=pltpu.CompilerParams(dimension_semantics=("parallel",)),
            cost_estimate=cost,
        )(*flat_inputs)

    # Small batch (e.g. B=8): single gridless whole-block VMEM call. At this
    # size the kernel is launch/DMA-latency bound; amortize by batching calls
    # (vmap / concatenating rows) into one invocation when possible.
    vmem_spec = pl.BlockSpec(memory_space=pltpu.MemorySpace.VMEM)
    return pl.pallas_call(
        kernel,
        out_shape=out_shape,
        in_specs=[vmem_spec] * len(flat_inputs),
        out_specs=vmem_spec,
        cost_estimate=cost,
    )(*flat_inputs)


def init_mlp_params(key, input_size, hidden_sizes, output_size):
    """Deterministic PyTorch-style (uniform +-1/sqrt(fan_in)) init, f32, unpadded."""
    params = []
    prev = input_size
    sizes = list(hidden_sizes) + [output_size]
    for out in sizes:
        key, kw, kb = jax.random.split(key, 3)
        bound = 1.0 / jnp.sqrt(jnp.float32(prev))
        # stored as (in, out) so the kernel does x @ W
        w = jax.random.uniform(kw, (prev, out), jnp.float32, -bound, bound)
        b = jax.random.uniform(kb, (out,), jnp.float32, -bound, bound)
        params.append((w, b))
        prev = out
    return params


if __name__ == "__main__":
    # model_config = {'input_size': 32, 'hidden_size': [64, 64], 'output_size': 16}
    input_size = 32
    hidden_sizes = [64, 64]
    output_size = 16
    batch = 8

    key = jax.random.PRNGKey(0)
    key, kx, kxb = jax.random.split(key, 3)
    x = jax.random.normal(kx, (batch, input_size), jnp.float32)

    params = init_mlp_params(key, input_size, hidden_sizes, output_size)
    prepped = prepare_params(params)  # one-time: bf16 weights, (1, N) f32 biases

    fwd = jax.jit(lambda xx: mlp_forward_pallas(xx, prepped))
    out = jax.block_until_ready(fwd(x))

    # References.
    def ref_f32(xx):
        h = xx
        for i, (w, b) in enumerate(params):
            h = h @ w + b
            if i < len(params) - 1:
                h = jnp.maximum(h, 0.0)
        return h

    def ref_bf16(xx):
        h = xx.astype(jnp.bfloat16)
        for i, (w, b) in enumerate(prepped):
            h = jnp.dot(h, w, preferred_element_type=jnp.float32) + b
            if i < len(prepped) - 1:
                h = jnp.maximum(h, 0.0).astype(jnp.bfloat16)
        return h

    assert out.shape == (batch, output_size)
    assert jnp.allclose(out, ref_bf16(x), atol=1e-3, rtol=1e-3)  # kernel plumbing
    assert jnp.allclose(out, ref_f32(x), atol=5e-2, rtol=5e-2)   # bf16-class error vs f32

    # Large-batch path: row-tiled grid, parallel across TensorCores on v7x.
    big_b = 512
    xb = jax.random.normal(kxb, (big_b, input_size), jnp.float32)
    out_b = jax.block_until_ready(jax.jit(lambda xx: mlp_forward_pallas(xx, prepped))(xb))
    assert out_b.shape == (big_b, output_size)
    assert jnp.allclose(out_b, ref_bf16(xb), atol=1e-3, rtol=1e-3)

    print("KERNEL_OK")
</pallas_src>

<mosaic_0001>
module attributes {stable_mosaic.version = 11 : i64} {
  func.func @_mlp_fused_kernel(%arg0: memref<8x32xf32, #tpu.memory_space<vmem>>, %arg1: memref<32x64xbf16, #tpu.memory_space<vmem>>, %arg2: memref<1x64xf32, #tpu.memory_space<vmem>>, %arg3: memref<64x64xbf16, #tpu.memory_space<vmem>>, %arg4: memref<1x64xf32, #tpu.memory_space<vmem>>, %arg5: memref<64x16xbf16, #tpu.memory_space<vmem>>, %arg6: memref<1x16xf32, #tpu.memory_space<vmem>>, %arg7: memref<8x16xf32, #tpu.memory_space<vmem>>) attributes {dimension_semantics = [], scalar_prefetch = 0 : i64, scratch_operands = 0 : i64, tpu.core_type = #tpu.core_type<tc>} {
    %c0 = arith.constant 0 : index
    %c0_0 = arith.constant 0 : index
    %0 = vector.load %arg0[%c0, %c0_0] : memref<8x32xf32, #tpu.memory_space<vmem>>, vector<8x32xf32>
    %1 = arith.truncf %0 : vector<8x32xf32> to vector<8x32xbf16>
    %c0_1 = arith.constant 0 : index
    %c0_2 = arith.constant 0 : index
    %2 = vector.load %arg1[%c0_1, %c0_2] : memref<32x64xbf16, #tpu.memory_space<vmem>>, vector<32x64xbf16>
    %cst = arith.constant dense<0.000000e+00> : vector<8x64xf32>
    %3 = tpu.matmul %1, %2, %cst {dimension_numbers = #tpu.dot_dimension_numbers<[1], [0], [0], [1], [0, 0, 1, 1], [], []>} : vector<8x32xbf16>, vector<32x64xbf16>, vector<8x64xf32> -> vector<8x64xf32>
    %c0_3 = arith.constant 0 : index
    %c0_4 = arith.constant 0 : index
    %4 = vector.load %arg2[%c0_3, %c0_4] : memref<1x64xf32, #tpu.memory_space<vmem>>, vector<1x64xf32>
    %5 = vector.broadcast %4 : vector<1x64xf32> to vector<8x64xf32>
    %6 = arith.addf %3, %5 : vector<8x64xf32>
    %cst_5 = arith.constant 0.000000e+00 : f32
    %7 = vector.broadcast %cst_5 : f32 to vector<8x64xf32>
    %8 = arith.maximumf %6, %7 : vector<8x64xf32>
    %9 = arith.truncf %8 : vector<8x64xf32> to vector<8x64xbf16>
    %c0_6 = arith.constant 0 : index
    %c0_7 = arith.constant 0 : index
    %10 = vector.load %arg3[%c0_6, %c0_7] : memref<64x64xbf16, #tpu.memory_space<vmem>>, vector<64x64xbf16>
    %cst_8 = arith.constant dense<0.000000e+00> : vector<8x64xf32>
    %11 = tpu.matmul %9, %10, %cst_8 {dimension_numbers = #tpu.dot_dimension_numbers<[1], [0], [0], [1], [0, 0, 1, 1], [], []>} : vector<8x64xbf16>, vector<64x64xbf16>, vector<8x64xf32> -> vector<8x64xf32>
    %c0_9 = arith.constant 0 : index
    %c0_10 = arith.constant 0 : index
    %12 = vector.load %arg4[%c0_9, %c0_10] : memref<1x64xf32, #tpu.memory_space<vmem>>, vector<1x64xf32>
    %13 = vector.broadcast %12 : vector<1x64xf32> to vector<8x64xf32>
    %14 = arith.addf %11, %13 : vector<8x64xf32>
    %cst_11 = arith.constant 0.000000e+00 : f32
    %15 = vector.broadcast %cst_11 : f32 to vector<8x64xf32>
    %16 = arith.maximumf %14, %15 : vector<8x64xf32>
    %17 = arith.truncf %16 : vector<8x64xf32> to vector<8x64xbf16>
    %c0_12 = arith.constant 0 : index
    %c0_13 = arith.constant 0 : index
    %18 = vector.load %arg5[%c0_12, %c0_13] : memref<64x16xbf16, #tpu.memory_space<vmem>>, vector<64x16xbf16>
    %cst_14 = arith.constant dense<0.000000e+00> : vector<8x16xf32>
    %19 = tpu.matmul %17, %18, %cst_14 {dimension_numbers = #tpu.dot_dimension_numbers<[1], [0], [0], [1], [0, 0, 1, 1], [], []>} : vector<8x64xbf16>, vector<64x16xbf16>, vector<8x16xf32> -> vector<8x16xf32>
    %c0_15 = arith.constant 0 : index
    %c0_16 = arith.constant 0 : index
    %20 = vector.load %arg6[%c0_15, %c0_16] : memref<1x16xf32, #tpu.memory_space<vmem>>, vector<1x16xf32>
    %21 = vector.broadcast %20 : vector<1x16xf32> to vector<8x16xf32>
    %22 = arith.addf %19, %21 : vector<8x16xf32>
    %c0_17 = arith.constant 0 : index
    %c0_18 = arith.constant 0 : index
    %23 = vector.load %arg7[%c0_17, %c0_18] : memref<8x16xf32, #tpu.memory_space<vmem>>, vector<8x16xf32>
    tpu.vector_store %arg7[%c0_17, %c0_18], %22 {strides = array<i32>} : memref<8x16xf32, #tpu.memory_space<vmem>>, vector<8x16xf32>,
    return
  }
}

</mosaic_0001>

<bundles_post_ra>
// kernel: _lambda_.1
= control target key start
LH: loop header
LB: loop body
LE: loop exit
PB: predicated region body
PF: predicated region fallthrough
CT: control target
= control target key end

     0   :  { %12 = vsyncpa [#allocation3], 0  ;;  %s672_s0 = inlined_call_operand.hbm [shape: f32[8,32], index: 0, kind: input, shape index: {}]   ;;  %s673_s1 = inlined_call_operand.hbm [shape: bf16[32,64], index: 1, kind: input, shape index: {}]   ;;  %s674_s2 = inlined_call_operand.hbm [shape: f32[1,64], index: 2, kind: input, shape index: {}]   ;;  %s675_s3 = inlined_call_operand.hbm [shape: bf16[64,64], index: 3, kind: input, shape index: {}]   ;;  %s676_s4 = inlined_call_operand.vmem [shape: f32[1,64], index: 4, kind: input, shape index: {}]   ;;  %s677_s5 = inlined_call_operand.vmem [shape: bf16[64,16], index: 5, kind: input, shape index: {}]   ;;  %s678_s6 = inlined_call_operand.vmem [shape: f32[1,16], index: 6, kind: input, shape index: {}]   ;;  %s679_s7 = inlined_call_operand.hbm [shape: f32[8,16], index: 7, kind: output, shape index: {}]  }
   0x1   :  { %13 = vsyncpa [#allocation6], 0 }
   0x2   :  { %14 = vsyncpa [#allocation9], 0 }
   0x3   :  { %15 = vsyncpa [#allocation4], 0  ;;  %s534_s24 = smov [#allocation5]   ;;  %s416_s28 = scalar_lea.hbm %s673_s1, 256 }
   0x4   :  { %s31_s25 = sshll.u32 %s534_s24, 4  ;;  %p417_p0 = scmp.ne.s32.totalorder %s673_s1, %s416_s28  ;;  %s32_s25 = int_to_ptr.vmem [resolvable:$true] %s31_s25 }
   0x5   :  { %p420_p1 = scmp.lt.u32.totalorder %s416_s28, %s673_s1 }
   0x7   :  { %p422_p2 = pnand %p420_p1, %p417_p0 }
   0x9   :  { %425 = shalt.err (!%p422_p2)
}
   0xa   :  { %s426_s10 = scalar_lea.vmem %s32_s25, 256  ;;  %p431_p4 = scmp.lt.s32.totalorder %s32_s25, %s32_s25 }
   0xb   :  { %p427_p3 = scmp.ne.s32.totalorder %s32_s25, %s426_s10  ;;  %p432_p5 = scmp.lt.s32.totalorder %s426_s10, %s426_s10 }
   0xd   :  { %p433_p6 = por %p432_p5, %p431_p4 }
   0xf   :  { %p434_p7 = pnand %p433_p6, %p427_p3 }
  0x11   :  { %437 = shalt.err (!%p434_p7)
}
  0x12   :  { %s535_s11 = smov 64   ;;  %s536_s12 = smov 4  }
  0x13   :  { %37 = dma.hbm_to_vmem [thread:$0]  %s673_s1, 256, %s32_s25, [#allocation6], %s535_s11, %s535_s11, %s536_s12  }
  0x14   :  { %s537_s15 = smov [#allocation2]   ;;  %s538_s17 = smov [#allocation7]  }
  0x15   :  { %s22_s16 = sshll.u32 %s537_s15, 4  ;;  %s44_s18 = sshll.u32 %s538_s17, 4  ;;  %s23_s16 = int_to_ptr.vmem [resolvable:$true] %s22_s16  ;;  %s45_s18 = int_to_ptr.vmem [resolvable:$true] %s44_s18 }
  0x16   :  { %s438_s21 = scalar_lea.hbm %s672_s0, 128 }
  0x17   :  { %p439_p8 = scmp.ne.s32.totalorder %s672_s0, %s438_s21  ;;  %p442_p9 = scmp.lt.u32.totalorder %s438_s21, %s672_s0 }
  0x19   :  { %p444_p10 = pnand %p442_p9, %p439_p8 }
  0x1b   :  { %447 = shalt.err (!%p444_p10)
}
  0x1c   :  { %s448_s1 = scalar_lea.vmem %s23_s16, 128  ;;  %p453_p12 = scmp.lt.s32.totalorder %s23_s16, %s23_s16 }
  0x1d   :  { %p449_p11 = scmp.ne.s32.totalorder %s23_s16, %s448_s1  ;;  %p454_p13 = scmp.lt.s32.totalorder %s448_s1, %s448_s1 }
  0x1f   :  { %p455_p0 = por %p454_p13, %p453_p12 }
  0x21   :  { %p456_p1 = pnand %p455_p0, %p449_p11 }
  0x23   :  { %459 = shalt.err (!%p456_p1)
}
  0x24   :  { %25 = dma.hbm_to_vmem [thread:$0]  %s672_s0, 128, %s23_s16, [#allocation3]  }
  0x25   :  { %s460_s30 = scalar_lea.hbm %s674_s2, 16 }
  0x26   :  { %p461_p2 = scmp.ne.s32.totalorder %s674_s2, %s460_s30  ;;  %p464_p3 = scmp.lt.u32.totalorder %s460_s30, %s674_s2 }
  0x28   :  { %p466_p4 = pnand %p464_p3, %p461_p2 }
  0x2a   :  { %469 = shalt.err (!%p466_p4)
}
  0x2b   :  { %s470_s14 = scalar_lea.vmem %s45_s18, 16  ;;  %s474_s15 = scalar_lea.vmem %s45_s18, 32 }
  0x2c   :  { %p471_p5 = scmp.ne.s32.totalorder %s45_s18, %s470_s14  ;;  %p475_p6 = scmp.lt.s32.totalorder %s45_s18, %s45_s18 }
  0x2d   :  { %p476_p7 = scmp.lt.s32.totalorder %s474_s15, %s470_s14 }
  0x2f   :  { %p477_p8 = por %p476_p7, %p475_p6 }
  0x31   :  { %p478_p9 = pnand %p477_p8, %p471_p5 }
  0x33   :  { %481 = shalt.err (!%p478_p9)
}
  0x34   :  { %47 = dma.hbm_to_vmem [thread:$0]  %s674_s2, 16, %s45_s18, [#allocation6]  }
  0x35   :  { %s539_s17 = smov [#allocation8]   ;;  %s482_s22 = scalar_lea.hbm %s675_s3, 512 }
  0x36   :  { %s53_s19 = sshll.u32 %s539_s17, 4  ;;  %p483_p10 = scmp.ne.s32.totalorder %s675_s3, %s482_s22  ;;  %s54_s19 = int_to_ptr.vmem [resolvable:$true] %s53_s19 }
  0x37   :  { %p486_p11 = scmp.lt.u32.totalorder %s482_s22, %s675_s3 }
  0x39   :  { %p488_p12 = pnand %p486_p11, %p483_p10 }
  0x3b   :  { %491 = shalt.err (!%p488_p12)
}
  0x3c   :  { %s492_s25 = scalar_lea.vmem %s54_s19, 512  ;;  %p497_p0 = scmp.lt.s32.totalorder %s54_s19, %s54_s19 }
  0x3d   :  { %p493_p13 = scmp.ne.s32.totalorder %s54_s19, %s492_s25  ;;  %p498_p1 = scmp.lt.s32.totalorder %s492_s25, %s492_s25 }
  0x3f   :  { %p499_p2 = por %p498_p1, %p497_p0 }
  0x41   :  { %p500_p3 = pnand %p499_p2, %p493_p13 }
  0x43   :  { %503 = shalt.err (!%p500_p3)
}
  0x44   :  { %59 = dma.hbm_to_vmem [thread:$0]  %s675_s3, 512, %s54_s19, [#allocation9], %s535_s11, %s535_s11, %s536_s12  }
  0x45   :  { %526 = dma.done.wait [#allocation3], 128  }
  0x46   :  { %527 = vsyncadd [#allocation3], 4294967168 }
  0x47   :  { %528 = dma.done.wait [#allocation6], 272  }
  0x48   :  { %529 = vsyncadd [#allocation6], 4294967024 }
  0x49   :  { %530 = dma.done.wait [#allocation9], 512  }
  0x4a   :  { %531 = vsyncadd [#allocation9], 4294966784  ;;  %v540_v0 = vmov 0.0   ;;  %vm541_vm0 = vmmov 0   ;;  %v406_v1 = vld [vmem:[#allocation5] sm:$0xff]   ;;  %v407_v2 = vld [vmem:[#allocation5 + $0x8] sm:$0xff]  }
  0x4b   :  { %365 = vmatprep.subr.bf16.mxu0 %v540_v0  ;;  %369 = vmatprep.mubr.msk.bf16.mxu0 %vm541_vm0, %v540_v0  ;;  %v79_v3 = vld [vmem:[#allocation2] sm:$0xff]  ;;  %vm104_vm1 = vcmask 261120   ;;  %v410_v7 = vld [vmem:[#allocation8 + $0x10] sm:$0xff]   ;;  %v411_v8 = vld [vmem:[#allocation8 + $0x18] sm:$0xff]   ;;  %vm189_vm2 = vcmask 523264   ;;  %s542_s15 = smov [#allocation10]  }
  0x4c   :  { %373 = vmatprep.subr.bf16.mxu1 %v540_v0  ;;  %381 = vmatprep.mubr.msk.bf16.mxu1 %vm541_vm0, %v540_v0  ;;  %v408_v4 = vld [vmem:[#allocation8] sm:$0xff]   ;;  %v409_v5 = vld [vmem:[#allocation8 + $0x8] sm:$0xff]   ;;  %v80_v6 = vpack.c.bf16 %v79_v3, %v79_v3  ;;  %v336_v11 = vld [vmem:[#allocation7] ss:$0 sm:$0xff]  ;;  %vm317_vm3 = vcmask 130048  }
  0x4d   :  { %366 = vmatpush3.bf16.msra.mxu0 %v406_v1  ;;  %374 = vmatpush3.bf16.msra.mxu1 %v408_v4  ;;  %v412_v9 = vld [vmem:[%s677_s5] sm:$0xff]   ;;  %v413_v10 = vld [vmem:[%s677_s5 + $0x8] sm:$0xff]   ;;  %v414_v19 = vld [vmem:[%s677_s5 + $0x10] sm:$0xff]  }
  0x4e   :  { %367 = vmatprep.subr.bf16.mxu0 %v540_v0  ;;  %375 = vmatprep.subr.bf16.mxu1 %v540_v0  ;;  %v415_v20 = vld [vmem:[%s677_s5 + $0x18] sm:$0xff]   ;;  %v340_v21 = vld [vmem:[%s676_s4] ss:$0 sm:$0xff]  ;;  %s325_s5 = sshll.u32 %s542_s15, 4  ;;  %s326_s5 = int_to_ptr.vmem [resolvable:$true] %s325_s5 }
  0x4f   :  { %v346_v29 = vld [vmem:[%s678_s6] ss:$0 sm:$0xff]  ;;  %s504_s4 = scalar_lea.vmem %s326_s5, 128  ;;  %p509_p5 = scmp.lt.s32.totalorder %s326_s5, %s326_s5 }
  0x50   :  { %p505_p4 = scmp.ne.s32.totalorder %s326_s5, %s504_s4  ;;  %p510_p6 = scmp.lt.s32.totalorder %s504_s4, %s504_s4 }
  0x51   :  { %368 = vmatpush3.bf16.msra.mxu0 %v407_v2  ;;  %376 = vmatpush3.bf16.msra.mxu1 %v409_v5 }
  0x52   :  { %385 = vmatprep.subr.bf16.mxu0 %v540_v0  ;;  %377 = vmatprep.subr.bf16.mxu1 %v540_v0  ;;  %p511_p7 = por %p510_p6, %p509_p5 }
  0x54   :  { %370 = vmatmul.mubr.msk.bf16.vlgmr.msra.gmra.mrb[0].mxu0 %vm104_vm1, %v80_v6  ;;  %p512_p8 = pnand %p511_p7, %p505_p4 }
  0x55   :  { %393 = vmatprep.mubr.msk.bf16.mxu0 %vm541_vm0, %v540_v0  ;;  %378 = vmatpush3.bf16.msra.mxu1 %v410_v7 }
  0x56   :  { %379 = vmatprep.subr.bf16.mxu1 %v540_v0  ;;  %386 = vmatpush3.bf16.msra.mxu0 %v412_v9 }
  0x57   :  { %387 = vmatprep.subr.bf16.mxu0 %v540_v0 }
  0x59   :  { %380 = vmatpush3.bf16.msra.mxu1 %v411_v8 }
  0x5a   :  { %388 = vmatpush3.bf16.msra.mxu0 %v413_v10 }
  0x5b   :  { %389 = vmatprep.subr.bf16.mxu0 %v540_v0 }
  0x5e   :  { %390 = vmatpush3.bf16.msra.mxu0 %v414_v19 }
  0x5f   :  { %391 = vmatprep.subr.bf16.mxu0 %v540_v0 }
  0x62   :  { %392 = vmatpush3.bf16.msra.mxu0 %v415_v20 }
 0x127   :  { %v142_v12 = vpop.f32.mrb[0].mxu0 }
 0x128   :  { %v143_v13 = vadd.f32 %v336_v11, %v142_v12  ;;  %v371_v14 = vpop.f32.mrb[1].mxu0 }
 0x129   :  { %v145_v15 = vpop.f32.mrb[2].mxu0 }
 0x12a   :  { %v148_v16 = vmax.f32 %v143_v13, 0.0  ;;  %v372_v17 = vpop.f32.mrb[3].mxu0 }
 0x12c   :  { %v149_v18 = vpack.c.bf16 %v148_v16, %v148_v16 }
 0x12e   :  { %382 = vmatmul.mubr.msk.bf16.vlgmr.msra.gmra.mrb[0].mxu1 %vm189_vm2, %v149_v18 }
 0x201   :  { %v227_v22 = vpop.f32.mrb[0].mxu1 }
 0x202   :  { %v228_v23 = vadd.f32 %v340_v21, %v227_v22  ;;  %v383_v24 = vpop.f32.mrb[1].mxu1 }
 0x203   :  { %v230_v25 = vpop.f32.mrb[2].mxu1 }
 0x204   :  { %v233_v26 = vmax.f32 %v228_v23, 0.0  ;;  %v384_v27 = vpop.f32.mrb[3].mxu1 }
 0x206   :  { %v234_v28 = vpack.c.bf16 %v233_v26, %v233_v26 }
 0x208   :  { %394 = vmatmul.mubr.msk.bf16.vlgmr.msra.gmra.mrb[4].mxu0 %vm189_vm2, %v234_v28 }
 0x2db   :  { %v311_v30 = vpop.f32.mrb[4].mxu0 }
 0x2dc   :  { %v312_v31 = vadd.f32 %v346_v29, %v311_v30  ;;  %v395_v32 = vpop.f32.mrb[5].mxu0 }
 0x2dd   :  { %v314_v33 = vpop.f32.mrb[6].mxu0 }
 0x2de   :  { %v396_v34 = vpop.f32.mrb[7].mxu0  ;;  %318 = vst.msk [vmem:[#allocation10] sm:$0xff] %vm317_vm3, %v312_v31 }
 0x2df   :  { %515 = shalt.err (!%p512_p8)
}
 0x2e0   :  { %s516_s6 = scalar_lea.hbm %s679_s7, 128 }
 0x2e1   :  { %p517_p9 = scmp.ne.s32.totalorder %s679_s7, %s516_s6  ;;  %p520_p10 = scmp.lt.u32.totalorder %s516_s6, %s679_s7 }
 0x2e3   :  { %p522_p11 = pnand %p520_p10, %p517_p9 }
 0x2e5   :  { %525 = shalt.err (!%p522_p11)
}
 0x2e6   :  { %328 = dma.vmem_to_hbm [thread:$0]  %s326_s5, 128, %s679_s7, [#allocation4]  }
 0x2e7   :  { %532 = dma.done.wait [#allocation4], 128  }
 0x2e8   :  { %533 = vsyncadd [#allocation4], 4294967168 }
 0x2e9   :  { %332 = vsyncpa [#allocation3], 1 }
 0x2ea   :  { %333 = vsyncpa [#allocation6], 1 }
 0x2eb   :  { %334 = vsyncpa [#allocation9], 1 }
 0x2ec   :  { %335 = vsyncpa [#allocation4], 1 }

</bundles_post_ra>
